<compile_context>
chip_gen: v7x
topology: tpu7x:2x2x1
jax: 0.10.0
libtpu: 0.0.40
codegen_flags: <defaults>
</compile_context>

<pallas_src>
import functools
import math

import jax
import jax.numpy as jnp
from jax.experimental import pallas as pl
from jax.experimental.pallas import tpu as pltpu


# ----------------------------------------------------------------------------
# small helpers
# ----------------------------------------------------------------------------
def _round_up(x, m):
    return ((x + m - 1) // m) * m


def _cdiv(a, b):
    return -(-a // b)


def _tpu_vmem_and_cores():
    """(vmem_capacity_bytes, tensorcores_per_chip) with conservative fallbacks:
    128 MiB (v5e/v6e size) and 1 TensorCore when the info query is unavailable."""
    cap = 128 * 1024 * 1024
    cores = 1
    try:
        info = pltpu.get_tpu_info()
        cap = int(getattr(info, "vmem_capacity_bytes", cap)) or cap
        for attr in ("num_cores", "num_tensorcores", "tensorcore_count", "core_count"):
            v = getattr(info, attr, None)
            if v:
                cores = int(v)
                break
    except Exception:
        pass
    return cap, cores


def _vmem_limit_bytes():
    cap, _ = _tpu_vmem_and_cores()
    return min(int(0.75 * cap), 100 * 1024 * 1024)


def _pick_tile_rows(n_rows, row_bytes, resident_bytes):
    """Largest multiple-of-8 row tile whose double-buffered footprint fits a
    conservative slice of this generation's VMEM.  The >=2-grid-step cap is
    only applied when the chip has >1 TensorCore (v7x); single-TC v5e/v6e keep
    one big tile (perf-review feedback)."""
    cap, cores = _tpu_vmem_and_cores()
    budget = int(0.4 * cap)
    avail = max(budget - 2 * resident_bytes, 2 * 8 * row_bytes)
    tile = max(8, min(avail // (2 * row_bytes), 2048))
    n8 = _round_up(max(int(n_rows), 1), 8)
    if cores > 1:
        tile = min(tile, max(8, _round_up(_cdiv(n8, cores), 8)))
    tile = min(tile, n8)
    return max(8, (tile // 8) * 8)


def _pad_rows(x, n_pad):
    n = x.shape[0]
    if n_pad == n:
        return x
    pad = [(0, n_pad - n)] + [(0, 0)] * (x.ndim - 1)
    return jnp.pad(x, pad)


# ----------------------------------------------------------------------------
# kernel 1: projection  feat_aug = h_src @ [W_src^T | (attn_l W_src)^T]
# ----------------------------------------------------------------------------
def _proj_kernel(x_ref, w_ref, o_ref):
    o_ref[...] = jnp.dot(
        x_ref[...], w_ref[...], preferred_element_type=jnp.float32
    ).astype(o_ref.dtype)


def pallas_project(x, w):
    """x:[N,Fin], w:[Fin,Fout] (both bf16) -> x @ w (bf16, f32 accumulation).
    No lane / contraction padding: blocks use the full (unpadded) last dims."""
    n, f_in = x.shape
    f_out = w.shape[1]
    esz = x.dtype.itemsize
    row_bytes = esz * (f_in + f_out)
    resident = esz * f_in * f_out
    tile_n = _pick_tile_rows(n, row_bytes, resident)
    n_pad = _round_up(n, tile_n)
    x = _pad_rows(x, n_pad)

    out = pl.pallas_call(
        _proj_kernel,
        out_shape=jax.ShapeDtypeStruct((n_pad, f_out), x.dtype),
        grid_spec=pltpu.PrefetchScalarGridSpec(
            num_scalar_prefetch=0,
            grid=(n_pad // tile_n,),
            in_specs=[
                pl.BlockSpec((tile_n, f_in), lambda i: (i, 0)),
                # constant index_map -> weight stays resident across grid steps
                pl.BlockSpec((f_in, f_out), lambda i: (0, 0)),
            ],
            out_specs=pl.BlockSpec((tile_n, f_out), lambda i: (i, 0)),
        ),
        compiler_params=pltpu.CompilerParams(
            dimension_semantics=("parallel",),
            vmem_limit_bytes=_vmem_limit_bytes(),
        ),
        cost_estimate=pl.CostEstimate(
            flops=2 * n_pad * f_in * f_out,
            transcendentals=0,
            bytes_accessed=esz * (n_pad * f_in + f_in * f_out + n_pad * f_out),
        ),
    )(x, w)
    return out[:n]


# ----------------------------------------------------------------------------
# kernel 2: GAT aggregation (er in-kernel, edge softmax over K, weighted sum)
# ----------------------------------------------------------------------------
def _gat_kernel(slab_ref, hcat_ref, ver_ref, b_ref, o_ref, *, k_nbr, d):
    d1 = d + 1
    slab = slab_ref[...].astype(jnp.float32)           # (tile_n, K*(D+1))
    hcat = hcat_ref[...]                                # (tile_n, D) f32
    # er folded in-kernel from the resident attn_r @ W_dst vector.
    er = jnp.sum(hcat * ver_ref[...], axis=-1, keepdims=True)      # (tile_n, 1)
    el = jnp.concatenate(
        [slab[:, kk * d1 + d:kk * d1 + d1] for kk in range(k_nbr)], axis=-1)
    e = el + er
    e = jnp.where(e > 0, e, 0.2 * e)                    # LeakyReLU(0.2)
    e = e - jnp.max(e, axis=-1, keepdims=True)
    p = jnp.exp(e)
    alpha = p / jnp.sum(p, axis=-1, keepdims=True)      # edge softmax over K
    acc = jnp.zeros(o_ref.shape, jnp.float32)
    for kk in range(k_nbr):                             # K is small and static
        acc = acc + slab[:, kk * d1:kk * d1 + d] * alpha[:, kk:kk + 1]
    o_ref[...] = (acc + b_ref[...]).astype(o_ref.dtype)


def pallas_gat_aggregate(slab, h_cat, v_er, bias):
    """slab:[N, K*(D+1)] bf16 gathered [feat_src | el] rows, h_cat:[N,D] f32,
    v_er:[D] = attn_r @ W_dst, bias:[D]  ->  [N,D] GAT output (num_heads=1)."""
    n, width = slab.shape
    d = h_cat.shape[1]
    d1 = d + 1
    k_nbr = width // d1
    row_bytes = slab.dtype.itemsize * width + 4 * d + 4 * d
    tile_n = _pick_tile_rows(n, row_bytes, resident_bytes=8 * d)
    n_pad = _round_up(n, tile_n)
    slab = _pad_rows(slab, n_pad)
    h_cat = _pad_rows(h_cat, n_pad)
    ver = v_er.reshape(1, d).astype(jnp.float32)
    b = bias.reshape(1, d).astype(jnp.float32)

    out = pl.pallas_call(
        functools.partial(_gat_kernel, k_nbr=k_nbr, d=d),
        out_shape=jax.ShapeDtypeStruct((n_pad, d), jnp.float32),
        grid_spec=pltpu.PrefetchScalarGridSpec(
            num_scalar_prefetch=0,
            grid=(n_pad // tile_n,),
            in_specs=[
                pl.BlockSpec((tile_n, width), lambda i: (i, 0)),
                pl.BlockSpec((tile_n, d), lambda i: (i, 0)),
                pl.BlockSpec((1, d), lambda i: (0, 0)),   # resident er vector
                pl.BlockSpec((1, d), lambda i: (0, 0)),   # resident bias
            ],
            out_specs=pl.BlockSpec((tile_n, d), lambda i: (i, 0)),
        ),
        compiler_params=pltpu.CompilerParams(
            dimension_semantics=("parallel",),
            vmem_limit_bytes=_vmem_limit_bytes(),
        ),
        cost_estimate=pl.CostEstimate(
            flops=n_pad * (3 * k_nbr * d + 2 * d),
            transcendentals=n_pad * k_nbr,
            bytes_accessed=slab.dtype.itemsize * n_pad * width + 8 * n_pad * d,
        ),
    )(slab, h_cat, ver, b)
    return out[:n]


# ----------------------------------------------------------------------------
# kernel 3: batched per-view score reduction  sum_rows tanh(one @ W_fc^T + b)
# ----------------------------------------------------------------------------
def _score_kernel(ones_ref, w_ref, b_ref, o_ref, *, n_valid, tile_n):
    r = pl.program_id(1)

    @pl.when(r == 0)
    def _init():
        o_ref[...] = jnp.zeros_like(o_ref)

    x = ones_ref[0]                                     # (tile_n, D) f32
    t = jnp.tanh(
        jnp.dot(x, w_ref[...], preferred_element_type=jnp.float32) + b_ref[...])
    rows = jax.lax.broadcasted_iota(jnp.int32, t.shape, 0) + r * tile_n
    t = jnp.where(rows < n_valid, t, 0.0)               # mask padded rows
    o_ref[0] = o_ref[0] + jnp.sum(t, axis=0, keepdims=True)


def pallas_view_scores(ones, fc_w, fc_b):
    """ones:[M,N,D] f32 -> [M,D] column sums of tanh(one @ fc_w^T + fc_b).
    The [N,D] tanh activations never round-trip HBM (in-VMEM reduction)."""
    m, n, d = ones.shape
    tile_n = _pick_tile_rows(n, 4 * d, resident_bytes=4 * d * (d + 2))
    n_pad = _round_up(n, tile_n)
    if n_pad != n:
        ones = jnp.pad(ones, ((0, 0), (0, n_pad - n), (0, 0)))
    w = fc_w.T.astype(jnp.float32)
    b = fc_b.reshape(1, d).astype(jnp.float32)

    out = pl.pallas_call(
        functools.partial(_score_kernel, n_valid=n, tile_n=tile_n),
        out_shape=jax.ShapeDtypeStruct((m, 1, d), jnp.float32),
        grid_spec=pltpu.PrefetchScalarGridSpec(
            num_scalar_prefetch=0,
            grid=(m, n_pad // tile_n),
            in_specs=[
                pl.BlockSpec((1, tile_n, d), lambda v, r: (v, r, 0)),
                pl.BlockSpec((d, d), lambda v, r: (0, 0)),
                pl.BlockSpec((1, d), lambda v, r: (0, 0)),
            ],
            out_specs=pl.BlockSpec((1, 1, d), lambda v, r: (v, 0, 0)),
        ),
        compiler_params=pltpu.CompilerParams(
            dimension_semantics=("parallel", "arbitrary"),
            vmem_limit_bytes=_vmem_limit_bytes(),
        ),
        cost_estimate=pl.CostEstimate(
            flops=2 * m * n_pad * d * d,
            transcendentals=m * n_pad * d,
            bytes_accessed=4 * (m * n_pad * d + d * d + m * d),
        ),
    )(ones, w, b)
    return out.reshape(m, d)


# ----------------------------------------------------------------------------
# kernel 4: semantic combine  z = sum_m beta_m * one_m  (beta via SMEM prefetch)
# ----------------------------------------------------------------------------
def _combine_kernel(beta_ref, ones_ref, o_ref, *, n_views):
    acc = ones_ref[0] * beta_ref[0]
    for mm in range(1, n_views):                        # M is small and static
        acc = acc + ones_ref[mm] * beta_ref[mm]
    o_ref[...] = acc.astype(o_ref.dtype)


def pallas_semantic_combine(ones, beta):
    """ones:[M,N,D] f32, beta:[M] f32 (SMEM scalar prefetch) -> z:[N,D] f32."""
    m, n, d = ones.shape
    row_bytes = 4 * d * (m + 1)
    tile_n = _pick_tile_rows(n, row_bytes, resident_bytes=0)
    n_pad = _round_up(n, tile_n)
    if n_pad != n:
        ones = jnp.pad(ones, ((0, 0), (0, n_pad - n), (0, 0)))

    out = pl.pallas_call(
        functools.partial(_combine_kernel, n_views=m),
        out_shape=jax.ShapeDtypeStruct((n_pad, d), jnp.float32),
        grid_spec=pltpu.PrefetchScalarGridSpec(
            num_scalar_prefetch=1,                      # beta lives in SMEM
            grid=(n_pad // tile_n,),
            in_specs=[
                pl.BlockSpec((m, tile_n, d), lambda i, beta: (0, i, 0)),
            ],
            out_specs=pl.BlockSpec((tile_n, d), lambda i, beta: (i, 0)),
        ),
        compiler_params=pltpu.CompilerParams(
            dimension_semantics=("parallel",),
            vmem_limit_bytes=_vmem_limit_bytes(),
        ),
        cost_estimate=pl.CostEstimate(
            flops=2 * m * n_pad * d,
            transcendentals=0,
            bytes_accessed=4 * (m * n_pad * d + n_pad * d),
        ),
    )(beta.astype(jnp.float32), ones)
    return out[:n]


# ----------------------------------------------------------------------------
# Sc_encoder forward (Pallas pipeline) and a pure-JAX f32 reference
# ----------------------------------------------------------------------------
def sc_encoder_forward(params, h, nbr_indices, category,
                       compute_dtype=jnp.bfloat16):
    h_cat = h[category]                                 # f32 (small stream)
    n_cat, d = h_cat.shape
    intra = []
    for i, p in enumerate(params["gat"]):
        h_src = h[p["src_type"]].astype(compute_dtype)
        # Fold the "el" source logit in as one extra output column.
        w_aug = jnp.concatenate(
            [p["w_src"].T, (p["attn_l"] @ p["w_src"])[:, None]], axis=1)
        feat_aug = pallas_project(h_src, w_aug.astype(compute_dtype))
        # TODO(synk): dgl.sampling.sample_neighbors (replace=True) and the
        # sampled-row gather stay in XLA; only pre-sampled ids are consumed.
        idx = nbr_indices[i]
        slab = feat_aug[idx].reshape(n_cat, -1)         # [N, K*(D+1)] bf16
        v_er = p["attn_r"] @ p["w_dst"]                 # er folded in-kernel
        one = pallas_gat_aggregate(slab, h_cat, v_er, p["bias"])
        intra.append(one)

    # Semantic-level attention (SelfAttention 'sc').
    ones = jnp.stack(intra, axis=0)                     # [M, N, D] f32
    t_sums = pallas_view_scores(ones, params["fc_w"], params["fc_b"])
    scores = (t_sums / n_cat) @ params["att"]           # [M]
    beta = jax.nn.softmax(scores)
    z_sc = pallas_semantic_combine(ones, beta)
    return z_sc, beta


def sc_encoder_reference(params, h, nbr_indices, category):
    h_cat = h[category]
    intra = []
    for i, p in enumerate(params["gat"]):
        h_src = h[p["src_type"]]
        fsrc = h_src @ p["w_src"].T
        fdst = h_cat @ p["w_dst"].T
        el = fsrc @ p["attn_l"]
        er = fdst @ p["attn_r"]
        idx = nbr_indices[i]
        e = el[idx] + er[:, None]
        e = jnp.where(e > 0, e, 0.2 * e)
        alpha = jax.nn.softmax(e, axis=-1)
        one = jnp.einsum("nk,nkd->nd", alpha, fsrc[idx]) + p["bias"]
        intra.append(one)
    att = params["att"]
    w = jnp.stack(
        [att @ jnp.mean(jnp.tanh(o @ params["fc_w"].T + params["fc_b"]), axis=0)
         for o in intra])
    beta = jax.nn.softmax(w)
    z = sum(b * o for b, o in zip(beta, intra))
    return z, beta


def xavier_normal(key, shape, gain=1.0):
    fan_out, fan_in = shape[0], shape[-1]
    std = gain * math.sqrt(2.0 / (fan_in + fan_out))
    return std * jax.random.normal(key, shape, dtype=jnp.float32)


if __name__ == "__main__":
    hidden = 32
    category = "paper"
    network_schema = [("author", "ap", "paper"), ("subject", "sp", "paper")]
    num_nodes = {"paper": 24, "author": 16, "subject": 8}
    sample_rate = {"author": 4, "subject": 3}
    # attn_drop = 0.0 -> dropout is identity (eval mode).
    # TODO(synk): stochastic attn_drop (nn.Dropout) not implemented in-kernel.

    key = jax.random.PRNGKey(0)
    kit = iter(jax.random.split(key, 24))

    h = {t: jax.random.normal(next(kit), (n, hidden), dtype=jnp.float32)
         for t, n in num_nodes.items()}

    gat_params = []
    for (src, _etype, _dst) in network_schema:
        gat_params.append(dict(
            src_type=src,
            w_src=xavier_normal(next(kit), (hidden, hidden), gain=math.sqrt(2.0)),
            w_dst=xavier_normal(next(kit), (hidden, hidden), gain=math.sqrt(2.0)),
            attn_l=xavier_normal(next(kit), (1, hidden), gain=math.sqrt(2.0))[0],
            attn_r=xavier_normal(next(kit), (1, hidden), gain=math.sqrt(2.0))[0],
            bias=jnp.zeros((hidden,), jnp.float32),
        ))
    params = dict(
        gat=gat_params,
        fc_w=xavier_normal(next(kit), (hidden, hidden), gain=1.414),
        fc_b=0.01 * jax.random.normal(next(kit), (hidden,), dtype=jnp.float32),
        att=xavier_normal(next(kit), (1, hidden), gain=1.414)[0],
    )

    # TODO(synk): graph neighbor sampling (dgl.sampling.sample_neighbors with
    # replace=True) is emulated with uniform random neighbor ids.
    nbr_indices = []
    for (src, _etype, _dst) in network_schema:
        nbr_indices.append(jax.random.randint(
            next(kit), (num_nodes[category], sample_rate[src]),
            0, num_nodes[src], dtype=jnp.int32))

    z_sc, beta = sc_encoder_forward(params, h, nbr_indices, category)
    z_sc = jax.block_until_ready(z_sc)

    z_ref, beta_ref = sc_encoder_reference(params, h, nbr_indices, category)
    assert z_sc.shape == (num_nodes[category], hidden)
    assert jnp.allclose(beta, beta_ref, atol=2e-2, rtol=2e-2)
    # bf16 streams with f32 accumulation -> slightly looser tolerance vs f32 ref
    assert jnp.allclose(z_sc, z_ref, atol=5e-2, rtol=5e-2)

    print("KERNEL_OK")
</pallas_src>

<mosaic_0001>
module attributes {stable_mosaic.version = 11 : i64} {
  func.func @_proj_kernel(%arg0: i32, %arg1: memref<16x32xbf16, #tpu.memory_space<vmem>>, %arg2: memref<32x33xbf16, #tpu.memory_space<vmem>>, %arg3: memref<16x33xbf16, #tpu.memory_space<vmem>>) attributes {dimension_semantics = [#tpu.dimension_semantics<parallel>], iteration_bounds = array<i64: 1>, scalar_prefetch = 0 : i64, scratch_operands = 0 : i64, tpu.core_type = #tpu.core_type<tc>, window_params = [{transform_indices = @transform_0, window_bounds = array<i64: 16, 32>}, {pipeline_mode = #tpu.pipeline_mode<synchronous>, transform_indices = @transform_1, window_bounds = array<i64: 32, 33>}, {transform_indices = @transform_2, window_bounds = array<i64: 16, 33>}]} {
    %c0 = arith.constant 0 : index
    %c0_0 = arith.constant 0 : index
    %0 = vector.load %arg1[%c0, %c0_0] : memref<16x32xbf16, #tpu.memory_space<vmem>>, vector<16x32xbf16>
    %c0_1 = arith.constant 0 : index
    %c0_2 = arith.constant 0 : index
    %1 = vector.load %arg2[%c0_1, %c0_2] : memref<32x33xbf16, #tpu.memory_space<vmem>>, vector<32x33xbf16>
    %cst = arith.constant dense<0.000000e+00> : vector<16x33xf32>
    %2 = tpu.matmul %0, %1, %cst {dimension_numbers = #tpu.dot_dimension_numbers<[1], [0], [0], [1], [0, 0, 1, 1], [], []>} : vector<16x32xbf16>, vector<32x33xbf16>, vector<16x33xf32> -> vector<16x33xf32>
    %3 = arith.truncf %2 : vector<16x33xf32> to vector<16x33xbf16>
    %c0_3 = arith.constant 0 : index
    %c0_4 = arith.constant 0 : index
    %4 = vector.load %arg3[%c0_3, %c0_4] : memref<16x33xbf16, #tpu.memory_space<vmem>>, vector<16x33xbf16>
    tpu.vector_store %arg3[%c0_3, %c0_4], %3 {strides = array<i32>} : memref<16x33xbf16, #tpu.memory_space<vmem>>, vector<16x33xbf16>,
    return
  }
  func.func @transform_0(%arg0: i32) -> (i32, i32) {
    %c0_i32 = arith.constant 0 : i32
    %c0_i32_0 = arith.constant 0 : i32
    return %arg0, %c0_i32 : i32, i32
  }
  func.func @transform_1(%arg0: i32) -> (i32, i32) {
    %c0_i32 = arith.constant 0 : i32
    %c0_i32_0 = arith.constant 0 : i32
    %c0_i32_1 = arith.constant 0 : i32
    return %c0_i32, %c0_i32_0 : i32, i32
  }
  func.func @transform_2(%arg0: i32) -> (i32, i32) {
    %c0_i32 = arith.constant 0 : i32
    %c0_i32_0 = arith.constant 0 : i32
    return %arg0, %c0_i32 : i32, i32
  }
}

</mosaic_0001>

<bundles_post_ra>
// kernel: tpu_custom_call.1
= control target key start
LH: loop header
LB: loop body
LE: loop exit
PB: predicated region body
PF: predicated region fallthrough
CT: control target
= control target key end

     0   :  { %7 = vsyncpa [#allocation3], 0  ;;  %s306_s0 = inlined_call_operand.hbm [shape: bf16[16,32], index: 0, kind: input, shape index: {}]   ;;  %s307_s1 = inlined_call_operand.hbm [shape: bf16[32,33], index: 1, kind: input, shape index: {}]   ;;  %s308_s2 = inlined_call_operand.hbm [shape: bf16[16,33], index: 2, kind: output, shape index: {}]  }
   0x1   :  { %8 = vsyncpa [#allocation6], 0 }
   0x2   :  { %9 = vsyncpa [#allocation4], 0  ;;  %s239_s9 = smov [#allocation2]   ;;  %s167_s13 = scalar_lea.hbm %s306_s0, 128 }
   0x3   :  { %s15_s10 = sshll.u32 %s239_s9, 4  ;;  %p168_p0 = scmp.ne.s32.totalorder %s306_s0, %s167_s13  ;;  %s16_s10 = int_to_ptr.vmem [resolvable:$true] %s15_s10 }
   0x4   :  { %p171_p1 = scmp.lt.u32.totalorder %s167_s13, %s306_s0 }
   0x6   :  { %p173_p2 = pnand %p171_p1, %p168_p0 }
   0x8   :  { %176 = shalt.err (!%p173_p2)
}
   0x9   :  { %s177_s18 = scalar_lea.vmem %s16_s10, 128  ;;  %p182_p4 = scmp.lt.s32.totalorder %s16_s10, %s16_s10 }
   0xa   :  { %p178_p3 = scmp.ne.s32.totalorder %s16_s10, %s177_s18  ;;  %p183_p5 = scmp.lt.s32.totalorder %s177_s18, %s177_s18 }
   0xc   :  { %p184_p6 = por %p183_p5, %p182_p4 }
   0xe   :  { %p185_p7 = pnand %p184_p6, %p178_p3 }
  0x10   :  { %188 = shalt.err (!%p185_p7)
}
  0x11   :  { %s240_s19 = smov 64   ;;  %s241_s20 = smov 4  }
  0x12   :  { %21 = dma.hbm_to_vmem [thread:$0]  %s306_s0, 128, %s16_s10, [#allocation3], %s240_s19, %s240_s19, %s241_s20  }
  0x13   :  { %s242_s23 = smov [#allocation5]   ;;  %s189_s27 = scalar_lea.hbm %s307_s1, 256 }
  0x14   :  { %s27_s24 = sshll.u32 %s242_s23, 4  ;;  %p190_p8 = scmp.ne.s32.totalorder %s307_s1, %s189_s27  ;;  %s28_s24 = int_to_ptr.vmem [resolvable:$true] %s27_s24 }
  0x15   :  { %p193_p9 = scmp.lt.u32.totalorder %s189_s27, %s307_s1 }
  0x17   :  { %p195_p10 = pnand %p193_p9, %p190_p8 }
  0x19   :  { %198 = shalt.err (!%p195_p10)
}
  0x1a   :  { %s199_s4 = scalar_lea.vmem %s28_s24, 256  ;;  %p204_p12 = scmp.lt.s32.totalorder %s28_s24, %s28_s24 }
  0x1b   :  { %p200_p11 = scmp.ne.s32.totalorder %s28_s24, %s199_s4  ;;  %p205_p13 = scmp.lt.s32.totalorder %s199_s4, %s199_s4 }
  0x1d   :  { %p206_p0 = por %p205_p13, %p204_p12 }
  0x1f   :  { %p207_p1 = pnand %p206_p0, %p200_p11 }
  0x21   :  { %210 = shalt.err (!%p207_p1)
}
  0x22   :  { %33 = dma.hbm_to_vmem [thread:$0]  %s307_s1, 256, %s28_s24, [#allocation6], %s240_s19, %s240_s19, %s241_s20  }
  0x23   :  { %233 = dma.done.wait [#allocation3], 128  }
  0x24   :  { %234 = vsyncadd [#allocation3], 4294967168 }
  0x25   :  { %235 = dma.done.wait [#allocation6], 256  }
  0x26   :  { %236 = vsyncadd [#allocation6], 4294967040  ;;  %v243_v0 = vmov 0.0   ;;  %vm244_vm0 = vmmov 0   ;;  %v164_v1 = vld [vmem:[#allocation5] sm:$0xff]   ;;  %v165_v2 = vld [vmem:[#allocation5 + $0x8] sm:$0xff]  }
  0x27   :  { %149 = vmatprep.subr.bf16.mxu0 %v243_v0  ;;  %153 = vmatprep.mubr.msk.bf16.mxu0 %vm244_vm0, %v243_v0  ;;  %v166_v3 = vld [vmem:[#allocation2] sm:$0xff]   ;;  %vm64_vm1 = vcmask 261120   ;;  %vm117_vm2 = vcmask 265216   ;;  %s245_s6 = smov [#allocation7]  }
  0x28   :  { %150 = vmatpush3.bf16.msra.mxu0 %v164_v1  ;;  %s125_s1 = sshll.u32 %s245_s6, 4  ;;  %s126_s1 = int_to_ptr.vmem [resolvable:$true] %s125_s1 }
  0x29   :  { %151 = vmatprep.subr.bf16.mxu0 %v243_v0  ;;  %s211_s7 = scalar_lea.vmem %s126_s1, 128  ;;  %p216_p3 = scmp.lt.s32.totalorder %s126_s1, %s126_s1 }
  0x2a   :  { %p212_p2 = scmp.ne.s32.totalorder %s126_s1, %s211_s7  ;;  %p217_p4 = scmp.lt.s32.totalorder %s211_s7, %s211_s7 }
  0x2c   :  { %152 = vmatpush3.bf16.msra.mxu0 %v165_v2  ;;  %p218_p5 = por %p217_p4, %p216_p3 }
  0x2e   :  { %p219_p6 = pnand %p218_p5, %p212_p2 }
  0x2f   :  { %154 = vmatmul.mubr.msk.bf16.vlgmr.msra.gmra.mrb[0].mxu0 %vm64_vm1, %v166_v3 }
 0x102   :  { %v102_v4 = vpop.f32.mrb[0].mxu0 }
 0x103   :  { %v144_v5 = vpack.c.bf16 %v102_v4, %v102_v4  ;;  %v155_v6 = vpop.f32.mrb[1].mxu0 }
 0x104   :  { %v105_v7 = vpop.f32.mrb[2].mxu0 }
 0x105   :  { %v145_v8 = vpack.c.bf16 %v105_v7, %v105_v7  ;;  %v156_v9 = vpop.f32.mrb[3].mxu0  ;;  %118 = vst.msk [vmem:[#allocation7] sm:$0xf] %vm117_vm2, %v144_v5 }
 0x107   :  { %119 = vst.msk [vmem:[#allocation7 + $0x4] sm:$0xf] %vm117_vm2, %v145_v8 }
 0x108   :  { %222 = shalt.err (!%p219_p6)
}
 0x109   :  { %s223_s10 = scalar_lea.hbm %s308_s2, 128 }
 0x10a   :  { %p224_p7 = scmp.ne.s32.totalorder %s308_s2, %s223_s10  ;;  %p227_p8 = scmp.lt.u32.totalorder %s223_s10, %s308_s2 }
 0x10c   :  { %p229_p9 = pnand %p227_p8, %p224_p7 }
 0x10e   :  { %232 = shalt.err (!%p229_p9)
}
 0x10f   :  { %131 = dma.vmem_to_hbm [thread:$0]  %s126_s1, 128, %s308_s2, [#allocation4], %s240_s19, %s240_s19, %s241_s20  }
 0x110   :  { %237 = dma.done.wait [#allocation4], 128  }
 0x111   :  { %238 = vsyncadd [#allocation4], 4294967168 }
 0x112   :  { %135 = vsyncpa [#allocation3], 1 }
 0x113   :  { %136 = vsyncpa [#allocation6], 1 }
 0x114   :  { %137 = vsyncpa [#allocation4], 1 }

</bundles_post_ra>
